<compile_context>
chip_gen: v7x
topology: tpu7x:2x2x1
jax: 0.10.0
libtpu: 0.0.40
codegen_flags: <defaults>
</compile_context>

<pallas_src>
import jax
import jax.numpy as jnp
from jax.experimental import pallas as pl
from jax.experimental.pallas import tpu as pltpu

LANE = 128  # vreg lane width on v5e/v6e/v7x


def _round_up(x, m):
    return ((x + m - 1) // m) * m


def qnetwork_kernel(x_ref, w1_ref, b1_ref, w2_ref, b2_ref, w3_ref, b3_ref,
                    out_ref):
    """One batch tile of the full 3-layer MLP, entirely in VMEM.

    Weights arrive pre-transposed to (in, out) layout and cast to bf16; fc1's
    output (and fc2's input) is zero-padded to 128 lanes.  All matmuls run on
    the MXU in bf16 with f32 accumulation; bias-add / relu stay in f32.
    """
    x = x_ref[...]                                             # (tb, state) bf16

    # fc1 + relu  (output padded to 128 lanes -> lane-dense h1)
    h1 = jnp.dot(x, w1_ref[...], preferred_element_type=jnp.float32)
    h1 = jnp.maximum(h1 + b1_ref[...], 0.0)

    # fc2 + relu
    h2 = jnp.dot(h1.astype(w2_ref.dtype), w2_ref[...],
                 preferred_element_type=jnp.float32)
    h2 = jnp.maximum(h2 + b2_ref[...], 0.0)

    # fc3 + relu (fc4 is False in the default config, relu is still applied)
    h3 = jnp.dot(h2.astype(w3_ref.dtype), w3_ref[...],
                 preferred_element_type=jnp.float32)
    h3 = jnp.maximum(h3 + b3_ref[...], 0.0)

    out_ref[...] = h3.astype(out_ref.dtype)                    # (tb, action) f32


def prepare_params(params, compute_dtype=jnp.bfloat16):
    """One-time host-side relayout.

    Transpose weights to (in, out), cast matmul operands to bf16, zero-pad
    fc1's outputs (and fc2's matching input rows) to 128 lanes.  fc3 is kept
    at its true output width so the kernel writes a narrow, contiguous output.
    """
    w1, b1 = params["w1"], params["b1"]        # (fc1, state), (1, fc1)
    w2, b2 = params["w2"], params["b2"]        # (fc2, fc1),   (1, fc2)
    w3, b3 = params["w3"], params["b3"]        # (act, fc2),   (1, act)
    fc1_units = w1.shape[0]
    fc1_pad = _round_up(fc1_units, LANE)       # 64 -> 128: lane-dense h1, exact

    w1t = jnp.pad(w1.T, ((0, 0), (0, fc1_pad - fc1_units))).astype(compute_dtype)
    b1p = jnp.pad(b1, ((0, 0), (0, fc1_pad - fc1_units))).astype(jnp.float32)
    w2t = jnp.pad(w2.T, ((0, fc1_pad - fc1_units), (0, 0))).astype(compute_dtype)
    b2p = b2.astype(jnp.float32)
    w3t = w3.T.astype(compute_dtype)           # (fc2, action)  -- true width
    b3p = b3.astype(jnp.float32)

    return {
        "w1t": w1t, "b1": b1p,                 # (state, 128), (1, 128)
        "w2t": w2t, "b2": b2p,                 # (128, fc2),   (1, fc2)
        "w3t": w3t, "b3": b3p,                 # (fc2, act),   (1, act)
        "action_size": w3.shape[0],
    }


def qnetwork_forward(x, prepared, block_batch=2048):
    """x: (batch, state_size) float32. prepared: output of prepare_params()."""
    batch, state_size = x.shape
    w1t, b1 = prepared["w1t"], prepared["b1"]
    w2t, b2 = prepared["w2t"], prepared["b2"]
    w3t, b3 = prepared["w3t"], prepared["b3"]
    action_size = prepared["action_size"]

    fc1_pad = w1t.shape[1]
    fc2_units = w2t.shape[1]

    # Matmul operands in bf16 (accumulation stays f32 inside the kernel).
    x = x.astype(w1t.dtype)

    # Batch tile: multiple of 8 sublanes, >= 2 grid steps whenever possible
    # (so the "parallel" axis can split across v7x's two TensorCores), then
    # rebalanced so the last tile is not nearly empty.  No host-side padding
    # of x: Pallas masks the partial last block (safe: the MLP is row-wise).
    tb = min(block_batch, max(8, _round_up(pl.cdiv(batch, 2), 8)))
    n_tiles = pl.cdiv(batch, tb)
    tb = min(block_batch, max(8, _round_up(pl.cdiv(batch, n_tiles), 8)))
    grid = (pl.cdiv(batch, tb),)

    flops = 2 * batch * (state_size * fc1_pad
                         + fc1_pad * fc2_units
                         + fc2_units * action_size)
    bytes_accessed = (
        x.dtype.itemsize * batch * state_size
        + 4 * batch * action_size
        + w1t.size * w1t.dtype.itemsize + w2t.size * w2t.dtype.itemsize
        + w3t.size * w3t.dtype.itemsize
        + 4 * (b1.size + b2.size + b3.size))
    cost = pl.CostEstimate(flops=flops, transcendentals=0,
                           bytes_accessed=bytes_accessed)

    out = pl.pallas_call(
        qnetwork_kernel,
        out_shape=jax.ShapeDtypeStruct((batch, action_size), jnp.float32),
        grid=grid,
        in_specs=[
            # activations: tiled over batch, double-buffered by Pallas
            pl.BlockSpec((tb, state_size), lambda i: (i, 0)),
            # weights / biases: constant index_map -> resident across steps
            pl.BlockSpec((state_size, fc1_pad), lambda i: (0, 0)),
            pl.BlockSpec((1, fc1_pad), lambda i: (0, 0)),
            pl.BlockSpec((fc1_pad, fc2_units), lambda i: (0, 0)),
            pl.BlockSpec((1, fc2_units), lambda i: (0, 0)),
            pl.BlockSpec((fc2_units, action_size), lambda i: (0, 0)),
            pl.BlockSpec((1, action_size), lambda i: (0, 0)),
        ],
        out_specs=pl.BlockSpec((tb, action_size), lambda i: (i, 0)),
        compiler_params=pltpu.CompilerParams(
            dimension_semantics=("parallel",),   # 2 TCs on v7x; harmless v5e/v6e
            vmem_limit_bytes=32 << 20,
        ),
        cost_estimate=cost,
    )(x, w1t, b1, w2t, b2, w3t, b3)

    return out


def init_params(key, state_size, action_size, fc1_units=64, fc2_units=128):
    """PyTorch-default-style init: U(-1/sqrt(fan_in), 1/sqrt(fan_in)), PyTorch layout."""
    keys = jax.random.split(key, 6)

    def linear(kw, kb, fan_in, fan_out):
        bound = 1.0 / jnp.sqrt(jnp.float32(fan_in))
        w = jax.random.uniform(kw, (fan_out, fan_in), jnp.float32, -bound, bound)
        b = jax.random.uniform(kb, (1, fan_out), jnp.float32, -bound, bound)
        return w, b

    w1, b1 = linear(keys[0], keys[1], state_size, fc1_units)
    w2, b2 = linear(keys[2], keys[3], fc1_units, fc2_units)
    w3, b3 = linear(keys[4], keys[5], fc2_units, action_size)
    return {"w1": w1, "b1": b1, "w2": w2, "b2": b2, "w3": w3, "b3": b3}


def reference_forward(x, p):
    h1 = jnp.maximum(x @ p["w1"].T + p["b1"], 0.0)
    h2 = jnp.maximum(h1 @ p["w2"].T + p["b2"], 0.0)
    return jnp.maximum(h2 @ p["w3"].T + p["b3"], 0.0)


if __name__ == "__main__":
    key = jax.random.PRNGKey(0)
    k_param, k_x, k_x2 = jax.random.split(key, 3)

    batch, state_size, action_size = 2, 8, 4
    params = init_params(k_param, state_size, action_size)
    prepared = prepare_params(params)

    # small single-tile case
    x = jax.random.normal(k_x, (batch, state_size), jnp.float32)
    out = jax.block_until_ready(qnetwork_forward(x, prepared))
    ref = reference_forward(x, params)
    assert out.shape == (batch, action_size)
    assert jnp.allclose(out, ref, atol=5e-2, rtol=5e-2), "mismatch (single tile)"

    # multi-tile + uneven last tile (still tiny): exercises the grid path
    x2 = jax.random.normal(k_x2, (37, state_size), jnp.float32)
    out2 = jax.block_until_ready(qnetwork_forward(x2, prepared, block_batch=16))
    ref2 = reference_forward(x2, params)
    assert out2.shape == (37, action_size)
    assert jnp.allclose(out2, ref2, atol=5e-2, rtol=5e-2), "mismatch (multi tile)"

    print("KERNEL_OK")
</pallas_src>

<mosaic_0001>
module attributes {stable_mosaic.version = 11 : i64} {
  func.func @qnetwork_kernel(%arg0: i32, %arg1: memref<8x8xbf16, #tpu.memory_space<vmem>>, %arg2: memref<8x128xbf16, #tpu.memory_space<vmem>>, %arg3: memref<1x128xf32, #tpu.memory_space<vmem>>, %arg4: memref<128x128xbf16, #tpu.memory_space<vmem>>, %arg5: memref<1x128xf32, #tpu.memory_space<vmem>>, %arg6: memref<128x4xbf16, #tpu.memory_space<vmem>>, %arg7: memref<1x4xf32, #tpu.memory_space<vmem>>, %arg8: memref<8x4xf32, #tpu.memory_space<vmem>>) attributes {dimension_semantics = [#tpu.dimension_semantics<parallel>], iteration_bounds = array<i64: 1>, scalar_prefetch = 0 : i64, scratch_operands = 0 : i64, tpu.core_type = #tpu.core_type<tc>, window_params = [{transform_indices = @transform_0, window_bounds = array<i64: 8, 8>}, {pipeline_mode = #tpu.pipeline_mode<synchronous>, transform_indices = @transform_1, window_bounds = array<i64: 8, 128>}, {pipeline_mode = #tpu.pipeline_mode<synchronous>, transform_indices = @transform_2, window_bounds = array<i64: 1, 128>}, {pipeline_mode = #tpu.pipeline_mode<synchronous>, transform_indices = @transform_3, window_bounds = array<i64: 128, 128>}, {pipeline_mode = #tpu.pipeline_mode<synchronous>, transform_indices = @transform_4, window_bounds = array<i64: 1, 128>}, {pipeline_mode = #tpu.pipeline_mode<synchronous>, transform_indices = @transform_5, window_bounds = array<i64: 128, 4>}, {pipeline_mode = #tpu.pipeline_mode<synchronous>, transform_indices = @transform_6, window_bounds = array<i64: 1, 4>}, {transform_indices = @transform_7, window_bounds = array<i64: 8, 4>}]} {
    %c0 = arith.constant 0 : index
    %c0_0 = arith.constant 0 : index
    %0 = vector.load %arg1[%c0, %c0_0] : memref<8x8xbf16, #tpu.memory_space<vmem>>, vector<8x8xbf16>
    %c0_1 = arith.constant 0 : index
    %c0_2 = arith.constant 0 : index
    %1 = vector.load %arg2[%c0_1, %c0_2] : memref<8x128xbf16, #tpu.memory_space<vmem>>, vector<8x128xbf16>
    %cst = arith.constant dense<0.000000e+00> : vector<8x128xf32>
    %2 = tpu.matmul %0, %1, %cst {dimension_numbers = #tpu.dot_dimension_numbers<[1], [0], [0], [1], [0, 0, 1, 1], [], []>} : vector<8x8xbf16>, vector<8x128xbf16>, vector<8x128xf32> -> vector<8x128xf32>
    %c0_3 = arith.constant 0 : index
    %c0_4 = arith.constant 0 : index
    %3 = vector.load %arg3[%c0_3, %c0_4] : memref<1x128xf32, #tpu.memory_space<vmem>>, vector<1x128xf32>
    %4 = vector.broadcast %3 : vector<1x128xf32> to vector<8x128xf32>
    %5 = arith.addf %2, %4 : vector<8x128xf32>
    %cst_5 = arith.constant 0.000000e+00 : f32
    %6 = vector.broadcast %cst_5 : f32 to vector<8x128xf32>
    %7 = arith.maximumf %5, %6 : vector<8x128xf32>
    %8 = arith.truncf %7 : vector<8x128xf32> to vector<8x128xbf16>
    %c0_6 = arith.constant 0 : index
    %c0_7 = arith.constant 0 : index
    %9 = vector.load %arg4[%c0_6, %c0_7] : memref<128x128xbf16, #tpu.memory_space<vmem>>, vector<128x128xbf16>
    %cst_8 = arith.constant dense<0.000000e+00> : vector<8x128xf32>
    %10 = tpu.matmul %8, %9, %cst_8 {dimension_numbers = #tpu.dot_dimension_numbers<[1], [0], [0], [1], [0, 0, 1, 1], [], []>} : vector<8x128xbf16>, vector<128x128xbf16>, vector<8x128xf32> -> vector<8x128xf32>
    %c0_9 = arith.constant 0 : index
    %c0_10 = arith.constant 0 : index
    %11 = vector.load %arg5[%c0_9, %c0_10] : memref<1x128xf32, #tpu.memory_space<vmem>>, vector<1x128xf32>
    %12 = vector.broadcast %11 : vector<1x128xf32> to vector<8x128xf32>
    %13 = arith.addf %10, %12 : vector<8x128xf32>
    %cst_11 = arith.constant 0.000000e+00 : f32
    %14 = vector.broadcast %cst_11 : f32 to vector<8x128xf32>
    %15 = arith.maximumf %13, %14 : vector<8x128xf32>
    %16 = arith.truncf %15 : vector<8x128xf32> to vector<8x128xbf16>
    %c0_12 = arith.constant 0 : index
    %c0_13 = arith.constant 0 : index
    %17 = vector.load %arg6[%c0_12, %c0_13] : memref<128x4xbf16, #tpu.memory_space<vmem>>, vector<128x4xbf16>
    %cst_14 = arith.constant dense<0.000000e+00> : vector<8x4xf32>
    %18 = tpu.matmul %16, %17, %cst_14 {dimension_numbers = #tpu.dot_dimension_numbers<[1], [0], [0], [1], [0, 0, 1, 1], [], []>} : vector<8x128xbf16>, vector<128x4xbf16>, vector<8x4xf32> -> vector<8x4xf32>
    %c0_15 = arith.constant 0 : index
    %c0_16 = arith.constant 0 : index
    %19 = vector.load %arg7[%c0_15, %c0_16] : memref<1x4xf32, #tpu.memory_space<vmem>>, vector<1x4xf32>
    %20 = vector.broadcast %19 : vector<1x4xf32> to vector<8x4xf32>
    %21 = arith.addf %18, %20 : vector<8x4xf32>
    %cst_17 = arith.constant 0.000000e+00 : f32
    %22 = vector.broadcast %cst_17 : f32 to vector<8x4xf32>
    %23 = arith.maximumf %21, %22 : vector<8x4xf32>
    %c0_18 = arith.constant 0 : index
    %c0_19 = arith.constant 0 : index
    %24 = vector.load %arg8[%c0_18, %c0_19] : memref<8x4xf32, #tpu.memory_space<vmem>>, vector<8x4xf32>
    tpu.vector_store %arg8[%c0_18, %c0_19], %23 {strides = array<i32>} : memref<8x4xf32, #tpu.memory_space<vmem>>, vector<8x4xf32>,
    return
  }
  func.func @transform_0(%arg0: i32) -> (i32, i32) {
    %c0_i32 = arith.constant 0 : i32
    %c0_i32_0 = arith.constant 0 : i32
    return %arg0, %c0_i32 : i32, i32
  }
  func.func @transform_1(%arg0: i32) -> (i32, i32) {
    %c0_i32 = arith.constant 0 : i32
    %c0_i32_0 = arith.constant 0 : i32
    %c0_i32_1 = arith.constant 0 : i32
    return %c0_i32, %c0_i32_0 : i32, i32
  }
  func.func @transform_2(%arg0: i32) -> (i32, i32) {
    %c0_i32 = arith.constant 0 : i32
    %c0_i32_0 = arith.constant 0 : i32
    %c0_i32_1 = arith.constant 0 : i32
    return %c0_i32, %c0_i32_0 : i32, i32
  }
  func.func @transform_3(%arg0: i32) -> (i32, i32) {
    %c0_i32 = arith.constant 0 : i32
    %c0_i32_0 = arith.constant 0 : i32
    %c0_i32_1 = arith.constant 0 : i32
    return %c0_i32, %c0_i32_0 : i32, i32
  }
  func.func @transform_4(%arg0: i32) -> (i32, i32) {
    %c0_i32 = arith.constant 0 : i32
    %c0_i32_0 = arith.constant 0 : i32
    %c0_i32_1 = arith.constant 0 : i32
    return %c0_i32, %c0_i32_0 : i32, i32
  }
  func.func @transform_5(%arg0: i32) -> (i32, i32) {
    %c0_i32 = arith.constant 0 : i32
    %c0_i32_0 = arith.constant 0 : i32
    %c0_i32_1 = arith.constant 0 : i32
    return %c0_i32, %c0_i32_0 : i32, i32
  }
  func.func @transform_6(%arg0: i32) -> (i32, i32) {
    %c0_i32 = arith.constant 0 : i32
    %c0_i32_0 = arith.constant 0 : i32
    %c0_i32_1 = arith.constant 0 : i32
    return %c0_i32, %c0_i32_0 : i32, i32
  }
  func.func @transform_7(%arg0: i32) -> (i32, i32) {
    %c0_i32 = arith.constant 0 : i32
    %c0_i32_0 = arith.constant 0 : i32
    return %arg0, %c0_i32 : i32, i32
  }
}

</mosaic_0001>

<bundles_post_ra>
// kernel: tpu_custom_call.1
= control target key start
LH: loop header
LB: loop body
LE: loop exit
PB: predicated region body
PF: predicated region fallthrough
CT: control target
= control target key end

     0   :  { %12 = vsyncpa [#allocation3], 0  ;;  %vm72_vm0 = vcmask 1043456   ;;  %v49_v1 = vlaneseq  ;;  %v493_v2 = vmov 0.0   ;;  %vm494_vm1 = vmmov 0   ;;  %s646_s0 = inlined_call_operand.vmem [shape: bf16[2,8], index: 0, kind: input, shape index: {}]   ;;  %s647_s1 = inlined_call_operand.vmem [shape: bf16[8,128], index: 1, kind: input, shape index: {}]   ;;  %s648_s2 = inlined_call_operand.vmem [shape: f32[1,128], index: 2, kind: input, shape index: {}]   ;;  %s649_s3 = inlined_call_operand.vmem [shape: bf16[128,128], index: 3, kind: input, shape index: {}]   ;;  %s650_s4 = inlined_call_operand.vmem [shape: f32[1,128], index: 4, kind: input, shape index: {}]   ;;  %s651_s5 = inlined_call_operand.vmem [shape: bf16[128,4], index: 5, kind: input, shape index: {}]   ;;  %s652_s6 = inlined_call_operand.vmem [shape: f32[1,4], index: 6, kind: input, shape index: {}]   ;;  %s653_s7 = inlined_call_operand.hbm [shape: f32[2,4], index: 7, kind: output, shape index: {}]  }
   0x1   :  { %v32_v0 = vld [vmem:[%s647_s1] sm:$0xf]  ;;  %401 = vmatprep.subr.bf16.mxu0 %v493_v2  ;;  %407 = vmatprep.subr.bf16.mxu1 %v493_v2  ;;  %v495_v8 = vmov 1966171168   ;;  %v454_v15 = vld [vmem:[%s649_s3 + $0x8] sm:$0xff]   ;;  %vm68_vm2 = vcmask 64512  }
   0x2   :  { %v74_v3 = vsel %vm72_vm0, %v32_v0, 0  ;;  %v28_v4 = vld [vmem:[%s646_s0] sm:$0x1]  ;;  %v29_v5 = vld [vmem:[%s646_s0 + $0x1] sm:$0x1]  ;;  %403 = vmatprep.mubr.msk.bf16.mxu0 %vm494_vm1, %v493_v2  ;;  %v47_v9 = vunpack.c.l.s4 %v495_v8  ;;  %v50_v10 = vshrl.u32 %v49_v1, 7  ;;  %423 = vmatprep.mubr.msk.bf16.mxu1 %vm494_vm1, %v493_v2 }
   0x3   :  { %402 = vmatpush3.bf16.msra.mxu0 %v74_v3  ;;  %v30_v6 = vld [vmem:[%s646_s0 + $0x2] sm:$0x1]  ;;  %v31_v7 = vld [vmem:[%s646_s0 + $0x3] sm:$0x1]  ;;  %v44_v12 = vcombine.low %v28_v4, %v29_v5  ;;  %v455_v19 = vld [vmem:[%s649_s3 + $0x10] sm:$0xff]   ;;  %vm343_vm3 = vcmask 31744  }
   0x4   :  { %427 = vmatprep.subr.bf16.mxu0 %v493_v2  ;;  %v453_v11 = vld [vmem:[%s649_s3] sm:$0xff]   ;;  %v45_v13 = vcombine.low %v30_v6, %v31_v7  ;;  %v48_v14 = vunpack.c.0.s8 %v47_v9  ;;  %v456_v21 = vld [vmem:[%s649_s3 + $0x18] sm:$0xff]   ;;  %v458_v24 = vld [vmem:[%s649_s3 + $0x28] sm:$0xff]  }
   0x5   :  { %408 = vmatpush3.bf16.msra.mxu1 %v453_v11  ;;  %v457_v23 = vld [vmem:[%s649_s3 + $0x20] sm:$0xff]   ;;  %v459_v25 = vld [vmem:[%s649_s3 + $0x30] sm:$0xff]   ;;  %v460_v26 = vld [vmem:[%s649_s3 + $0x38] sm:$0xff]  }
   0x6   :  { %v51_v16 = vsub.s32 %v48_v14, %v50_v10  ;;  %409 = vmatprep.subr.bf16.mxu1 %v493_v2  ;;  %v461_v27 = vld [vmem:[%s651_s5] sm:$0xff]   ;;  %v462_v28 = vld [vmem:[%s651_s5 + $0x8] sm:$0xff]   ;;  %v463_v29 = vld [vmem:[%s651_s5 + $0x10] sm:$0xff]  }
   0x7   :  { %v464_v30 = vld [vmem:[%s651_s5 + $0x18] sm:$0xff]   ;;  %v465_v31 = vld [vmem:[%s651_s5 + $0x20] sm:$0xff]   ;;  %v466_v32 = vld [vmem:[%s651_s5 + $0x28] sm:$0xff]  }
   0x8   :  { %v52_v17 = vrot.slane %v44_v12, %v51_v16  ;;  %v59_v18 = vrot.slane %v45_v13, %v51_v16  ;;  %v361_v33 = vld [vmem:[%s648_s2] ss:$0 sm:$0xff]  ;;  %v467_v41 = vld [vmem:[%s651_s5 + $0x30] sm:$0xff]   ;;  %v468_v42 = vld [vmem:[%s651_s5 + $0x38] sm:$0xff]  }
   0x9   :  { %410 = vmatpush3.bf16.msra.mxu1 %v454_v15  ;;  %v363_v43 = vld [vmem:[%s650_s4] ss:$0 sm:$0xff] }
   0xa   :  { %v60_v20 = vcombine.low %v52_v17, %v59_v18  ;;  %411 = vmatprep.subr.bf16.mxu1 %v493_v2  ;;  %v372_v51 = vld [vmem:[%s652_s6] ss:$0 sm:$0xff] }
   0xc   :  { %v67_v22 = vrot.slane %v60_v20, %v51_v16 }
   0xd   :  { %412 = vmatpush3.bf16.msra.mxu1 %v455_v19 }
   0xe   :  { %404 = vmatmul.mubr.msk.bf16.vlgmr.msra.gmra.mrb[0].mxu0 %vm68_vm2, %v67_v22  ;;  %413 = vmatprep.subr.bf16.mxu1 %v493_v2 }
   0xf   :  { %443 = vmatprep.mubr.msk.bf16.mxu0 %vm494_vm1, %v493_v2  ;;  %428 = vmatpush3.bf16.msra.mxu0 %v461_v27 }
  0x10   :  { %429 = vmatprep.subr.bf16.mxu0 %v493_v2 }
  0x11   :  { %414 = vmatpush3.bf16.msra.mxu1 %v456_v21 }
  0x12   :  { %415 = vmatprep.subr.bf16.mxu1 %v493_v2 }
  0x13   :  { %430 = vmatpush3.bf16.msra.mxu0 %v462_v28 }
  0x14   :  { %431 = vmatprep.subr.bf16.mxu0 %v493_v2 }
  0x15   :  { %416 = vmatpush3.bf16.msra.mxu1 %v457_v23 }
  0x16   :  { %417 = vmatprep.subr.bf16.mxu1 %v493_v2 }
  0x17   :  { %432 = vmatpush3.bf16.msra.mxu0 %v463_v29 }
  0x18   :  { %433 = vmatprep.subr.bf16.mxu0 %v493_v2 }
  0x19   :  { %418 = vmatpush3.bf16.msra.mxu1 %v458_v24 }
  0x1a   :  { %419 = vmatprep.subr.bf16.mxu1 %v493_v2 }
  0x1b   :  { %434 = vmatpush3.bf16.msra.mxu0 %v464_v30 }
  0x1c   :  { %435 = vmatprep.subr.bf16.mxu0 %v493_v2 }
  0x1d   :  { %420 = vmatpush3.bf16.msra.mxu1 %v459_v25 }
  0x1e   :  { %421 = vmatprep.subr.bf16.mxu1 %v493_v2 }
  0x1f   :  { %436 = vmatpush3.bf16.msra.mxu0 %v465_v31 }
  0x20   :  { %437 = vmatprep.subr.bf16.mxu0 %v493_v2 }
  0x21   :  { %422 = vmatpush3.bf16.msra.mxu1 %v460_v26 }
  0x23   :  { %438 = vmatpush3.bf16.msra.mxu0 %v466_v32 }
  0x24   :  { %439 = vmatprep.subr.bf16.mxu0 %v493_v2 }
  0x27   :  { %440 = vmatpush3.bf16.msra.mxu0 %v467_v41 }
  0x28   :  { %441 = vmatprep.subr.bf16.mxu0 %v493_v2 }
  0x2b   :  { %442 = vmatpush3.bf16.msra.mxu0 %v468_v42 }
  0xe1   :  { %v110_v34 = vpop.f32.mrb[0].mxu0 }
  0xe2   :  { %v111_v35 = vadd.f32 %v361_v33, %v110_v34  ;;  %v405_v36 = vpop.f32.mrb[1].mxu0 }
  0xe3   :  { %v113_v37 = vpop.f32.mrb[2].mxu0 }
  0xe4   :  { %v116_v38 = vmax.f32 %v111_v35, 0.0  ;;  %v406_v39 = vpop.f32.mrb[3].mxu0 }
  0xe6   :  { %v117_v40 = vpack.c.bf16 %v116_v38, %v116_v38 }
  0xe8   :  { %424 = vmatmul.mubr.bf16.vlgmr.msra.gmra.mrb[0].mxu1 %v117_v40 }
 0x1bb   :  { %v223_v44 = vpop.f32.mrb[0].mxu1 }
 0x1bc   :  { %v224_v45 = vadd.f32 %v363_v43, %v223_v44  ;;  %v425_v46 = vpop.f32.mrb[1].mxu1 }
 0x1bd   :  { %v226_v47 = vpop.f32.mrb[2].mxu1 }
 0x1be   :  { %v229_v48 = vmax.f32 %v224_v45, 0.0  ;;  %v426_v49 = vpop.f32.mrb[3].mxu1 }
 0x1c0   :  { %v230_v50 = vpack.c.bf16 %v229_v48, %v229_v48 }
 0x1c2   :  { %444 = vmatmul.mubr.bf16.vlgmr.msra.gmra.mrb[4].mxu0 %v230_v50 }
 0x295   :  { %v336_v52 = vpop.f32.mrb[4].mxu0 }
 0x296   :  { %v337_v53 = vadd.f32 %v372_v51, %v336_v52  ;;  %v445_v54 = vpop.f32.mrb[5].mxu0 }
 0x297   :  { %v339_v55 = vpop.f32.mrb[6].mxu0 }
 0x298   :  { %v342_v56 = vmax.f32 %v337_v53, 0.0  ;;  %v446_v57 = vpop.f32.mrb[7].mxu0 }
 0x29a   :  { %344 = vst.msk [vmem:[#allocation2] sm:$0xff] %vm343_vm3, %v342_v56 }
 0x29b   :  { %349 = vsyncadd [#allocation3], 96  ;;  %s496_s4 = smov [#allocation2]  }
 0x29c   :  { %s350_s5 = sshll.u32 %s496_s4, 4  ;;  %s351_s5 = int_to_ptr.vmem [resolvable:$true] %s350_s5 }
 0x29d   :  { %s469_s20 = scalar_lea.vmem %s351_s5, 32  ;;  %s473_s21 = scalar_lea.vmem %s351_s5, 128 }
 0x29e   :  { %p470_p0 = scmp.ne.s32.totalorder %s351_s5, %s469_s20  ;;  %p474_p1 = scmp.lt.s32.totalorder %s351_s5, %s351_s5 }
 0x29f   :  { %p475_p2 = scmp.lt.s32.totalorder %s473_s21, %s469_s20 }
 0x2a1   :  { %p476_p3 = por %p475_p2, %p474_p1 }
 0x2a3   :  { %p477_p4 = pnand %p476_p3, %p470_p0 }
 0x2a5   :  { %480 = shalt.err (!%p477_p4)
}
 0x2a6   :  { %s481_s23 = scalar_lea.hbm %s653_s7, 32 }
 0x2a7   :  { %p482_p5 = scmp.ne.s32.totalorder %s653_s7, %s481_s23  ;;  %p485_p6 = scmp.lt.u32.totalorder %s481_s23, %s653_s7 }
 0x2a9   :  { %p487_p7 = pnand %p485_p6, %p482_p5 }
 0x2ab   :  { %490 = shalt.err (!%p487_p7)
}
 0x2ac   :  { %s497_s28 = smov 32   ;;  %s498_s29 = smov 2  }
 0x2ad   :  { %356 = dma.vmem_to_hbm [thread:$0]  %s351_s5, 32, %s653_s7, [#allocation3], %s497_s28, %s497_s28, %s498_s29  }
 0x2ae   :  { %491 = dma.done.wait [#allocation3], 128  }
 0x2af   :  { %492 = vsyncadd [#allocation3], 4294967168 }
 0x2b0   :  { %360 = vsyncpa [#allocation3], 1 }

</bundles_post_ra>
